<compile_context>
chip_gen: v7x
topology: tpu7x:2x2x1
jax: 0.10.0
libtpu: 0.0.40
codegen_flags: <defaults>
</compile_context>

<pallas_src>
import math

import jax
import jax.numpy as jnp
import numpy as np
from jax.experimental import pallas as pl
from jax.experimental.pallas import tpu as pltpu


def _vmem_budget_and_limit():
    """Generation-aware VMEM sizing: v5e/v6e have 128 MiB VMEM, v7x only 64 MiB per core."""
    cap = 64 * 1024 * 1024  # conservative default (v7x per-core capacity)
    try:
        info = pltpu.get_tpu_info()
        cap = int(getattr(info, "vmem_capacity_bytes", cap) or cap)
    except Exception:
        pass
    limit = min((cap * 3) // 4, 64 * 1024 * 1024)   # scoped limit requested from Mosaic
    budget = (limit * 3) // 4                        # target working set incl. double buffers
    return budget, limit


def _make_fused_kernel(c, compute_dtype):
    """Kernel for the zero-copy path.  Blocks:
       x_ref: (tm, c, B, H), w_ref: (c, H, tn), b_ref: (1, tn) f32, o_ref: (tm*B, tn)."""

    def kernel(x_ref, w_ref, b_ref, o_ref):
        rows = o_ref.shape[0]
        h_in = x_ref.shape[-1]
        acc = jnp.zeros(o_ref.shape, jnp.float32)
        # c is a small static constant; the loop is unrolled at trace time.  Each tap is one
        # MXU matmul accumulating into a local f32 value (no scratch load/store round trips).
        for k in range(c):
            x_k = x_ref[:, k, :, :].reshape(rows, h_in)   # layout no-op on this path
            w_k = w_ref[k]
            if compute_dtype is not None:
                x_k = x_k.astype(compute_dtype)
                w_k = w_k.astype(compute_dtype)
            acc = acc + jnp.dot(x_k, w_k, preferred_element_type=jnp.float32)
        o_ref[...] = (acc + b_ref[...]).astype(o_ref.dtype)

    return kernel


def _make_flat_kernel(compute_dtype):
    """Kernel for the flattened fallback path.  Blocks:
       x_ref: (rows, K), w_ref: (K, tn), b_ref: (1, tn) f32, o_ref: (rows, tn)."""

    def kernel(x_ref, w_ref, b_ref, o_ref):
        x = x_ref[...]
        w = w_ref[...]
        if compute_dtype is not None:
            x = x.astype(compute_dtype)
            w = w.astype(compute_dtype)
        acc = jnp.dot(x, w, preferred_element_type=jnp.float32)
        o_ref[...] = (acc + b_ref[...]).astype(o_ref.dtype)

    return kernel


def _choose_tn(h_pad, k_rows, w_size, budget):
    """Lane tile over the output hidden dim: largest of {512,256,128} dividing h_pad whose
    double-buffered weight block (k_rows x tn) stays within half the budget."""
    for cand in (512, 256, 128):
        if h_pad % cand == 0 and 2 * k_rows * cand * w_size <= budget // 2:
            return cand
    return 128   # h_pad is always a multiple of 128


def _pick_tm_fused(T, B, H, c, tn, x_size, w_size, out_size, budget):
    """Timesteps per M block for the fused path (rows per block = tm * B)."""
    fixed = 2 * c * H * tn * w_size + 4 * tn + (64 << 10)         # dbl-buf weights + bias
    per_t = 2 * c * B * H * x_size + 2 * B * tn * out_size + 4 * B * tn   # x, out, f32 acc
    tm = (budget - fixed) // max(per_t, 1)
    tm = int(max(1, min(tm, T)))
    if T >= 2:
        tm = min(tm, -(-T // 2))   # keep >=2 m-blocks so both v7x TensorCores get work
    # Round rows = tm*B toward a multiple of 256 (v6e/v7x MXUs are 2x256^2) when possible.
    step = 256 // math.gcd(256, B)
    if tm >= step:
        tm = (tm // step) * step
    return max(1, tm)


def _pick_rows_flat(M, K, tn, x_size, out_size, budget):
    """Rows per M block for the fallback path: 256-aligned (or multiple of 8), budgeted."""
    fixed = 2 * K * tn * 4 + 4 * tn + (64 << 10)
    per_row = 2 * K * x_size + 2 * tn * out_size + 4 * tn
    rows = (budget - fixed) // max(per_row, 1)
    rows = int(max(8, min(rows, 2048)))
    if rows >= M:
        return M
    if rows >= 256:
        return (rows // 256) * 256
    return max(8, (rows // 8) * 8)


def conv1d_compression(memories, weight, bias, compression_rate, *, prefer_bf16_matmul=False):
    """Pallas TPU forward of Conv1dCompression.

    memories: [S, B, H]         (seq, batch, hidden) -- same layout the PyTorch module takes.
    weight:   [H_out, H_in, c]  nn.Conv1d weight (H_out == H_in == H).
    bias:     [H_out]
    Returns:  [S // c, B, H]
    """
    S, B, H = memories.shape
    c = int(compression_rate)
    if S < c:
        raise ValueError(f"seq_len={S} must be >= compression_rate={c}")
    T = S // c                       # trailing incomplete window dropped (Conv1d stride=c)
    M = T * B
    out_dtype = memories.dtype
    x_size = jnp.dtype(memories.dtype).itemsize
    w_size = jnp.dtype(weight.dtype).itemsize
    out_size = x_size

    # Optional bf16 MXU fast path for f32 inputs (off by default: preserves f32 numerics).
    compute_dtype = None
    if prefer_bf16_matmul and memories.dtype == jnp.float32:
        compute_dtype = jnp.bfloat16

    budget, vmem_limit = _vmem_budget_and_limit()

    # Conv1d weight [H_out, H_in, c] -> per-tap [c, H_in, H_out]; tiny, done in plain JAX.
    w_taps = jnp.transpose(weight, (2, 1, 0))
    b2 = bias.reshape(1, H).astype(jnp.float32)     # bias stays float32 end-to-end

    # Fused (zero-copy) path only when the in-kernel (tm, B, H)->(tm*B, H) fold is a pure
    # layout no-op: B multiple of the native sublane packing, H lane-aligned.
    sublanes = 8 * max(1, 4 // x_size)
    fused = (B % sublanes == 0) and (H % 128 == 0)

    if fused:
        h_pad = H
        tn = _choose_tn(h_pad, c * H, w_size, budget)
        tm = _pick_tm_fused(T, B, H, c, tn, x_size, w_size, out_size, budget)
        rows = tm * B
        grid = (pl.cdiv(T, tm), pl.cdiv(h_pad, tn))
        x_in = memories[: T * c].reshape(T, c, B, H)    # free view, no HBM copy
        in_specs = [
            # x block index is n-invariant: fetched once per m-block, reused over all n steps.
            pl.BlockSpec((tm, c, B, H), lambda m, n: (m, 0, 0, 0)),
            # weight block carries all c taps -> no per-tap refetch.
            pl.BlockSpec((c, H, tn), lambda m, n: (0, 0, n)),
            pl.BlockSpec((1, tn), lambda m, n: (0, n)),
        ]
        operands = (x_in, w_taps, b2)
        kernel = _make_fused_kernel(c, compute_dtype)
        extra_bytes = 0
    else:
        # TODO(synk): unaligned layouts (B % sublanes != 0 or H % 128 != 0) still materialize
        # one flattened copy of the windows in HBM; a zero-copy variant would need batch
        # padding or an in-kernel cross-sublane relayout.
        K = c * H
        h_pad = ((H + 127) // 128) * 128      # lane-dense output width (unmasked stores)
        tn = _choose_tn(h_pad, K, w_size, budget)
        rows = _pick_rows_flat(M, K, tn, x_size, out_size, budget)
        grid = (pl.cdiv(M, rows), pl.cdiv(h_pad, tn))
        x_in = (memories[: T * c]
                .reshape(T, c, B, H)
                .transpose(0, 2, 1, 3)         # [T, B, c, H]
                .reshape(M, K))                # rows = (t, b); cols = (k, i), k-major
        w_flat = w_taps.reshape(K, H)           # [(k, i), o] matching the column order
        if h_pad != H:
            w_flat = jnp.pad(w_flat, ((0, 0), (0, h_pad - H)))
            b2 = jnp.pad(b2, ((0, 0), (0, h_pad - H)))
        in_specs = [
            pl.BlockSpec((rows, K), lambda m, n: (m, 0)),
            pl.BlockSpec((K, tn), lambda m, n: (0, n)),
            pl.BlockSpec((1, tn), lambda m, n: (0, n)),
        ]
        operands = (x_in, w_flat, b2)
        kernel = _make_flat_kernel(compute_dtype)
        extra_bytes = 2 * M * K * x_size       # flatten copy: one extra HBM write + read

    cost = pl.CostEstimate(
        flops=2 * M * (c * H) * h_pad,
        transcendentals=0,
        bytes_accessed=int(T * c * B * H * x_size + c * H * h_pad * w_size
                           + h_pad * 4 + M * h_pad * out_size + extra_bytes),
    )

    out2d = pl.pallas_call(
        kernel,
        out_shape=jax.ShapeDtypeStruct((M, h_pad), out_dtype),
        grid_spec=pltpu.PrefetchScalarGridSpec(
            num_scalar_prefetch=0,
            grid=grid,
            in_specs=in_specs,
            out_specs=pl.BlockSpec((rows, tn), lambda m, n: (m, n)),
        ),
        compiler_params=pltpu.CompilerParams(
            dimension_semantics=("parallel", "parallel"),
            vmem_limit_bytes=vmem_limit,
        ),
        cost_estimate=cost,
    )(*operands)

    if h_pad != H:
        out2d = out2d[:, :H]       # strip the lane padding of the output channels
    return out2d.reshape(T, B, H)  # free: splits the leading dim only


def _reference(memories, weight, bias, c):
    # Pure-JAX reference: out[t, b, o] = bias[o] + sum_{i,k} weight[o,i,k] * mem[t*c+k, b, i]
    S, B, H = memories.shape
    T = S // c
    x = memories[: T * c].reshape(T, c, B, H)
    return jnp.einsum("tkbi,oik->tbo", x, weight) + bias[None, None, :]


def _run_case(S, B, H, c, key, dtype=jnp.float32, rtol=1e-4, atol=2e-5):
    k_mem, k_w, k_b = jax.random.split(key, 3)
    memories = jax.random.normal(k_mem, (S, B, H), dtype=jnp.float32)

    # Deterministic Conv1d-style init (uniform in +/- 1/sqrt(fan_in)), fan_in = H * c.
    bound = 1.0 / np.sqrt(H * c)
    weight = jax.random.uniform(k_w, (H, H, c), dtype=jnp.float32,
                                minval=-bound, maxval=bound)   # [H_out, H_in, c]
    bias = jax.random.uniform(k_b, (H,), dtype=jnp.float32,
                              minval=-bound, maxval=bound)

    memories_d = memories.astype(dtype)
    weight_d = weight.astype(dtype)

    out = jax.block_until_ready(conv1d_compression(memories_d, weight_d, bias, c))
    ref = jax.block_until_ready(
        _reference(memories_d.astype(jnp.float32), weight_d.astype(jnp.float32), bias, c))

    assert out.shape == (S // c, B, H), out.shape
    np.testing.assert_allclose(np.asarray(out, dtype=np.float32), np.asarray(ref),
                               rtol=rtol, atol=atol)


if __name__ == "__main__":
    key = jax.random.PRNGKey(0)
    k1, k2, k3 = jax.random.split(key, 3)

    # TPU-aligned small case (zero-copy fused path): seq=8, batch=8, hidden=128, rate=4.
    _run_case(8, 8, 128, 4, k1)
    # Unaligned small case (lane-padded flattened fallback): seq=8, batch=2, hidden=32, rate=4.
    _run_case(8, 2, 32, 4, k2)
    # Native bf16 inputs on the fused path (batch=16 so the bf16 sublane fold is a no-op).
    _run_case(8, 16, 128, 4, k3, dtype=jnp.bfloat16, rtol=2e-2, atol=1e-2)

    print("KERNEL_OK")
</pallas_src>

<mosaic_0001>
module attributes {stable_mosaic.version = 11 : i64} {
  func.func @kernel(%arg0: i32, %arg1: i32, %arg2: memref<1x4x8x128xf32, #tpu.memory_space<vmem>>, %arg3: memref<4x128x128xf32, #tpu.memory_space<vmem>>, %arg4: memref<1x128xf32, #tpu.memory_space<vmem>>, %arg5: memref<8x128xf32, #tpu.memory_space<vmem>>) attributes {dimension_semantics = [#tpu.dimension_semantics<parallel>, #tpu.dimension_semantics<parallel>], iteration_bounds = array<i64: 2, 1>, scalar_prefetch = 0 : i64, scratch_operands = 0 : i64, tpu.core_type = #tpu.core_type<tc>, window_params = [{transform_indices = @transform_0, window_bounds = array<i64: 1, 4, 8, 128>}, {transform_indices = @transform_1, window_bounds = array<i64: 4, 128, 128>}, {transform_indices = @transform_2, window_bounds = array<i64: 1, 128>}, {transform_indices = @transform_3, window_bounds = array<i64: 8, 128>}]} {
    %cst = arith.constant 0.000000e+00 : f32
    %0 = vector.broadcast %cst : f32 to vector<8x128xf32>
    %c0 = arith.constant 0 : index
    %c0_0 = arith.constant 0 : index
    %c0_1 = arith.constant 0 : index
    %c0_2 = arith.constant 0 : index
    %1 = vector.load %arg2[%c0, %c0_0, %c0_1, %c0_2] : memref<1x4x8x128xf32, #tpu.memory_space<vmem>>, vector<1x1x8x128xf32>
    %2 = vector.shape_cast %1 : vector<1x1x8x128xf32> to vector<1x8x128xf32>
    %3 = vector.shape_cast %2 : vector<1x8x128xf32> to vector<8x128xf32>
    %c0_3 = arith.constant 0 : index
    %c0_4 = arith.constant 0 : index
    %c0_5 = arith.constant 0 : index
    %4 = vector.load %arg3[%c0_3, %c0_4, %c0_5] : memref<4x128x128xf32, #tpu.memory_space<vmem>>, vector<1x128x128xf32>
    %5 = vector.shape_cast %4 : vector<1x128x128xf32> to vector<128x128xf32>
    %cst_6 = arith.constant dense<0.000000e+00> : vector<8x128xf32>
    %6 = tpu.matmul %3, %5, %cst_6 {dimension_numbers = #tpu.dot_dimension_numbers<[1], [0], [0], [1], [0, 0, 1, 1], [], []>} : vector<8x128xf32>, vector<128x128xf32>, vector<8x128xf32> -> vector<8x128xf32>
    %7 = arith.addf %0, %6 : vector<8x128xf32>
    %c0_7 = arith.constant 0 : index
    %c1 = arith.constant 1 : index
    %c0_8 = arith.constant 0 : index
    %c0_9 = arith.constant 0 : index
    %8 = vector.load %arg2[%c0_7, %c1, %c0_8, %c0_9] : memref<1x4x8x128xf32, #tpu.memory_space<vmem>>, vector<1x1x8x128xf32>
    %9 = vector.shape_cast %8 : vector<1x1x8x128xf32> to vector<1x8x128xf32>
    %10 = vector.shape_cast %9 : vector<1x8x128xf32> to vector<8x128xf32>
    %c1_10 = arith.constant 1 : index
    %c0_11 = arith.constant 0 : index
    %c0_12 = arith.constant 0 : index
    %11 = vector.load %arg3[%c1_10, %c0_11, %c0_12] : memref<4x128x128xf32, #tpu.memory_space<vmem>>, vector<1x128x128xf32>
    %12 = vector.shape_cast %11 : vector<1x128x128xf32> to vector<128x128xf32>
    %cst_13 = arith.constant dense<0.000000e+00> : vector<8x128xf32>
    %13 = tpu.matmul %10, %12, %cst_13 {dimension_numbers = #tpu.dot_dimension_numbers<[1], [0], [0], [1], [0, 0, 1, 1], [], []>} : vector<8x128xf32>, vector<128x128xf32>, vector<8x128xf32> -> vector<8x128xf32>
    %14 = arith.addf %7, %13 : vector<8x128xf32>
    %c0_14 = arith.constant 0 : index
    %c2 = arith.constant 2 : index
    %c0_15 = arith.constant 0 : index
    %c0_16 = arith.constant 0 : index
    %15 = vector.load %arg2[%c0_14, %c2, %c0_15, %c0_16] : memref<1x4x8x128xf32, #tpu.memory_space<vmem>>, vector<1x1x8x128xf32>
    %16 = vector.shape_cast %15 : vector<1x1x8x128xf32> to vector<1x8x128xf32>
    %17 = vector.shape_cast %16 : vector<1x8x128xf32> to vector<8x128xf32>
    %c2_17 = arith.constant 2 : index
    %c0_18 = arith.constant 0 : index
    %c0_19 = arith.constant 0 : index
    %18 = vector.load %arg3[%c2_17, %c0_18, %c0_19] : memref<4x128x128xf32, #tpu.memory_space<vmem>>, vector<1x128x128xf32>
    %19 = vector.shape_cast %18 : vector<1x128x128xf32> to vector<128x128xf32>
    %cst_20 = arith.constant dense<0.000000e+00> : vector<8x128xf32>
    %20 = tpu.matmul %17, %19, %cst_20 {dimension_numbers = #tpu.dot_dimension_numbers<[1], [0], [0], [1], [0, 0, 1, 1], [], []>} : vector<8x128xf32>, vector<128x128xf32>, vector<8x128xf32> -> vector<8x128xf32>
    %21 = arith.addf %14, %20 : vector<8x128xf32>
    %c0_21 = arith.constant 0 : index
    %c3 = arith.constant 3 : index
    %c0_22 = arith.constant 0 : index
    %c0_23 = arith.constant 0 : index
    %22 = vector.load %arg2[%c0_21, %c3, %c0_22, %c0_23] : memref<1x4x8x128xf32, #tpu.memory_space<vmem>>, vector<1x1x8x128xf32>
    %23 = vector.shape_cast %22 : vector<1x1x8x128xf32> to vector<1x8x128xf32>
    %24 = vector.shape_cast %23 : vector<1x8x128xf32> to vector<8x128xf32>
    %c3_24 = arith.constant 3 : index
    %c0_25 = arith.constant 0 : index
    %c0_26 = arith.constant 0 : index
    %25 = vector.load %arg3[%c3_24, %c0_25, %c0_26] : memref<4x128x128xf32, #tpu.memory_space<vmem>>, vector<1x128x128xf32>
    %26 = vector.shape_cast %25 : vector<1x128x128xf32> to vector<128x128xf32>
    %cst_27 = arith.constant dense<0.000000e+00> : vector<8x128xf32>
    %27 = tpu.matmul %24, %26, %cst_27 {dimension_numbers = #tpu.dot_dimension_numbers<[1], [0], [0], [1], [0, 0, 1, 1], [], []>} : vector<8x128xf32>, vector<128x128xf32>, vector<8x128xf32> -> vector<8x128xf32>
    %28 = arith.addf %21, %27 : vector<8x128xf32>
    %c0_28 = arith.constant 0 : index
    %c0_29 = arith.constant 0 : index
    %29 = vector.load %arg4[%c0_28, %c0_29] : memref<1x128xf32, #tpu.memory_space<vmem>>, vector<1x128xf32>
    %30 = vector.broadcast %29 : vector<1x128xf32> to vector<8x128xf32>
    %31 = arith.addf %28, %30 : vector<8x128xf32>
    %c0_30 = arith.constant 0 : index
    %c0_31 = arith.constant 0 : index
    %32 = vector.load %arg5[%c0_30, %c0_31] : memref<8x128xf32, #tpu.memory_space<vmem>>, vector<8x128xf32>
    tpu.vector_store %arg5[%c0_30, %c0_31], %31 {strides = array<i32>} : memref<8x128xf32, #tpu.memory_space<vmem>>, vector<8x128xf32>,
    return
  }
  func.func @transform_0(%arg0: i32, %arg1: i32) -> (i32, i32, i32, i32) {
    %c0_i32 = arith.constant 0 : i32
    %c0_i32_0 = arith.constant 0 : i32
    %c0_i32_1 = arith.constant 0 : i32
    %c0_i32_2 = arith.constant 0 : i32
    return %arg0, %c0_i32, %c0_i32_0, %c0_i32_1 : i32, i32, i32, i32
  }
  func.func @transform_1(%arg0: i32, %arg1: i32) -> (i32, i32, i32) {
    %c0_i32 = arith.constant 0 : i32
    %c0_i32_0 = arith.constant 0 : i32
    %c0_i32_1 = arith.constant 0 : i32
    return %c0_i32, %c0_i32_0, %arg1 : i32, i32, i32
  }
  func.func @transform_2(%arg0: i32, %arg1: i32) -> (i32, i32) {
    %c0_i32 = arith.constant 0 : i32
    %c0_i32_0 = arith.constant 0 : i32
    return %c0_i32, %arg1 : i32, i32
  }
  func.func @transform_3(%arg0: i32, %arg1: i32) -> (i32, i32) {
    %c0_i32 = arith.constant 0 : i32
    return %arg0, %arg1 : i32, i32
  }
}

</mosaic_0001>

<bundles_post_ra>
// kernel: tpu_custom_call.1
= control target key start
LH: loop header
LB: loop body
LE: loop exit
PB: predicated region body
PF: predicated region fallthrough
CT: control target
= control target key end

     0   :  { %8 = vsyncpa [#allocation3], 0  ;;  %s1573_s0 = inlined_call_operand.hbm [shape: f32[2,4,8,128], index: 0, kind: input, shape index: {}]   ;;  %s1574_s1 = inlined_call_operand.hbm [shape: f32[4,128,128], index: 1, kind: input, shape index: {}]   ;;  %s1575_s2 = inlined_call_operand.vmem [shape: f32[1,128], index: 2, kind: input, shape index: {}]   ;;  %s1576_s3 = inlined_call_operand.hbm [shape: f32[16,128], index: 3, kind: output, shape index: {}]  }
   0x1   :  { %10 = vsyncpa [#allocation3 + $0x1], 0 }
   0x2   :  { %11 = vsyncpa [#allocation6], 0 }
   0x3   :  { %12 = vsyncpa [#allocation4], 0 }
   0x4   :  { %14 = vsyncpa [#allocation4 + $0x1], 0  ;;  %s1300_s12 = smov 0   ;;  %s1302_s13 = smov 0  }
   0x5   :  { %s1304_s14 = smov 0   ;;  %s1306_s15 = smov 0  }
   0x6   :  { %s1308_s16 = smov 0   ;;  %s1310_s17 = smov 0  }
   0x7 LB: > { %s722_s18 = sadd.s32 4294967295, %s1270_s17   ;;  %s723_s19 = sadd.s32 4294967294, %s1270_s17   ;;  %s1270_s17 = sphi %s1310_s17, %s20_s17   ;;  %s1266_s16 = sphi %s1308_s16, %s1600_s16   ;;  %s1262_s15 = sphi %s1306_s15, %s1599_s15   ;;  %s1258_s14 = sphi %s1304_s14, %s1598_s14   ;;  %s1254_s13 = sphi %s1302_s13, %s1597_s13   ;;  %s1250_s12 = sphi %s1300_s12, %s1596_s12  }
   0x8   : > { %p52_p0 = scmp.ne.s32.totalorder %s1254_s13, %s1250_s12  ;;  %p1334_p1 = scmp.eq.s32.totalorder %s722_s18, 0 }
   0x9   : > { %p1338_p2 = scmp.eq.s32.totalorder %s722_s18, 1  ;;  %p136_p3 = scmp.eq.s32.totalorder %s723_s19, 1 }
   0xa   : > { %s1581_s20 = scalar_select %p1334_p1, 1, 0 }
   0xb   : > { %s1582_s21 = scalar_select %p1338_p2, 1, 0 }
   0xc   : > { %p1344_p4 = por %p1334_p1, %p52_p0  ;;  %p724_p5 = scmp.ge.s32.totalorder %s1270_s17, 1 }
   0xd   : > { %p1349_p6 = por %p136_p3, %p52_p0  ;;  %p143_p7 = scmp.lt.s32.totalorder %s1270_s17, 3 }
   0xe   : > { %s1583_s22 = scalar_select %p1344_p4, 1, 0 }
   0xf   : > { %s1584_s23 = scalar_select %p1349_p6, 1, 0 }
  0x10   : > { %p1354_p8 = pnand %p724_p5, %p143_p7  ;;  %s1272_s25 = smov [#allocation5]  }
  0x11   : > { %s157_s26 = sshll.u32 %s1272_s25, 4  ;;  %s32_s28 = sadd.s32 1, %s1266_s16  ;;  %s158_s26 = int_to_ptr.vmem [resolvable:$true] %s157_s26 }
  0x12   : > { %s1585_s24 = scalar_select %p1354_p8, 1, 0 }
  0x13   : > { %p1056_p9 = pneg %p1354_p8  ;;  %s1126_s4 = scalar_lea.hbm %s1574_s1, 8192 }
  0x14   : > { %p1127_p12 = scmp.ne.s32.totalorder %s1574_s1, %s1126_s4  ;;  %p1133_p5 = scmp.lt.u32.totalorder %s1126_s4, %s1574_s1 }
  0x15   : > { %p1363_p11 = pnand %p1056_p9, %p1334_p1 }
  0x17   : > { %p1128_p13 = pneg %p1363_p11 }
  0x19   : > { %p1129_p0 = pnand %p1128_p13, %p1127_p12 }
  0x1b   : > { %p1130_p3 = pneg %p1129_p0 }
  0x1d   : > { %p1135_p7 = pnand %p1133_p5, %p1130_p3 }
  0x1f   : > { %1138 = shalt.err (!%p1135_p7)
}
  0x20   : > { %s1139_s9 = scalar_lea.vmem %s158_s26, 8192  ;;  %p1147_p1 = scmp.lt.s32.totalorder %s158_s26, %s158_s26 }
  0x21   : > { %p1140_p9 = scmp.ne.s32.totalorder %s158_s26, %s1139_s9  ;;  %p1148_p4 = scmp.lt.s32.totalorder %s1139_s9, %s1139_s9 }
  0x23   : > { %p1142_p10 = pnand %p1140_p9, %p1128_p13  ;;  %p1149_p8 = por %p1148_p4, %p1147_p1 }
  0x25   : > { %p1143_p6 = pneg %p1142_p10 }
  0x27   : > { %p1150_p2 = pnand %p1149_p8, %p1143_p6 }
  0x29   : > { %1153 = shalt.err (!%p1150_p2)
}
  0x2a   : > { %s1273_s10 = smov 128   ;;  %s1274_s11 = smov 8  }
  0x2b   : > { %1059 = dma.hbm_to_vmem [thread:$0]  (!%p1363_p11), %s1574_s1, 8192, %s158_s26, [#allocation6], %s1273_s10, %s1273_s10, %s1274_s11  }
  0x2c   : > { %p34_p1 = scmp.ge.s32.totalorder %s32_s28, 2  ;;  %s39_s25 = sadd.s32 1, %s1258_s14 }
  0x2d   : > { %p46_p2 = scmp.ne.s32.totalorder %s1258_s14, %s1254_s13  ;;  %p47_p4 = scmp.eq.s32.totalorder %s1270_s17, 0 }
  0x2e   : > { %s1602_s28 = smov (%p34_p1, %s32_s28), 0  ;;  %p1588_p8 = scmp.ne.s32.totalorder %s1582_s21, 0 }
  0x2f   : > { %p1393_p6 = por %p47_p4, %p46_p2  ;;  %s36_s30 = ssub.s32 %s1266_s16, %s1602_s28 }
  0x30   : > { %p1399_p10 = por %p1588_p8, %p46_p2  ;;  %p1069_p12 = scmp.lt.s32.totalorder %s1270_s17, 2 }
  0x31   : > { %p37_p11 = scmp.eq.s32.totalorder %s36_s30, 0  ;;  %s177_s26 = sand.u32 1, %s1258_s14  }
  0x32   : > { %s728_s4 = sshll.u32 %s177_s26, 5  ;;  %s743_s6 = sshll.u32 %s1266_s16, 9 }
  0x33   : > { %s1408_s5 = scalar_select %p37_p11, %s1258_s14, %s39_s25  }
  0x34   : > { %s1414_s9 = scalar_lea.hbm %s1573_s0, %s743_s6  ;;  %s181_s21 = scalar_lea.vmem [#allocation2], %s728_s4 }
  0x35   : > { %s188_s18 = sshll.u32 %s181_s21, 4  ;;  %p1420_p13 = pnand %p1069_p12, %p1393_p6  ;;  %s1416_s18 = int_to_ptr.vmem [resolvable:$true] %s188_s18 }
  0x36   : > { %s1424_s25 = scalar_lea.sflag [#allocation3], %s177_s26  ;;  %s1154_s30 = scalar_lea.hbm %s1414_s9, 512 }
  0x37   : > { %p1155_p0 = scmp.ne.s32.totalorder %s1414_s9, %s1154_s30  ;;  %p1156_p3 = pneg %p1420_p13 }
  0x38   : > { %s1159_s29 = scalar_lea.hbm %s1573_s0, 1024  ;;  %p1160_p9 = scmp.lt.u32.totalorder %s1414_s9, %s1573_s0 }
  0x39   : > { %p1157_p5 = pnand %p1156_p3, %p1155_p0  ;;  %p1161_p1 = scmp.lt.u32.totalorder %s1159_s29, %s1154_s30 }
  0x3a   : > { %p1163_p4 = scmp.lt.u32.totalorder %s1154_s30, %s1414_s9 }
  0x3b   : > { %p1158_p7 = pneg %p1157_p5  ;;  %p1162_p2 = por %p1161_p1, %p1160_p9 }
  0x3d   : > { %p1164_p6 = por %p1163_p4, %p1162_p2 }
  0x3f   : > { %p1165_p8 = pnand %p1164_p6, %p1158_p7 }
  0x41   : > { %1168 = shalt.err (!%p1165_p8)
}
  0x42   : > { %s1169_s26 = scalar_lea.vmem %s1416_s18, 512  ;;  %s1275_s21 = smov [#allocation2]  }
  0x43   : > { %p1170_p12 = scmp.ne.s32.totalorder %s1416_s18, %s1169_s26  ;;  %s1174_s4 = sshll.u32 %s1275_s21, 4  ;;  %s1175_s4 = int_to_ptr.vmem [resolvable:$false] %s1174_s4 }
  0x44   : > { %s1176_s6 = scalar_lea.vmem %s1175_s4, 1024  ;;  %p1177_p5 = scmp.lt.s32.totalorder %s1416_s18, %s1175_s4 }
  0x45   : > { %p1172_p11 = pnand %p1170_p12, %p1156_p3  ;;  %p1178_p9 = scmp.lt.s32.totalorder %s1176_s6, %s1169_s26 }
  0x47   : > { %p1173_p0 = pneg %p1172_p11  ;;  %p1179_p1 = por %p1178_p9, %p1177_p5 }
  0x49   : > { %p1180_p2 = pnand %p1179_p1, %p1173_p0 }
  0x4b   : > { %1183 = shalt.err (!%p1180_p2)
}
  0x4c   : > { %1063 = dma.hbm_to_vmem [thread:$0]  (!%p1420_p13), %s1414_s9, 512, %s1416_s18, %s1424_s25, %s1273_s10, %s1273_s10, %s1274_s11  }
  0x4d   : > { %p1591_p3 = scmp.ne.s32.totalorder %s1585_s24, 0 }
  0x4e   : > { %s1458_s30 = sand.u32 (!%p1591_p3), 1, %s1254_s13   ;;  %p1592_p7 = scmp.ne.s32.totalorder (!%p1591_p3), %s1583_s22, 0 }
  0x4f   : > { %200 = sbr.rel (%p1591_p3) target bundleno = 389 (0x185), region = 32  ;;  %s732_s29 = sshll.u32 (!%p1591_p3), %s1458_s30, 5 }
  0x50   : > { %s203_s7 = scalar_lea.sflag (!%p1591_p3), [#allocation3], %s1458_s30  ;;  %s1462_s8 = scalar_lea.vmem (!%p1591_p3), [#allocation2], %s732_s29 }
  0x56   : > { %1237 = dma.done.wait (%p1592_p7), %s203_s7, 512  }
  0x57   : > { %1239 = vsyncadd (%p1592_p7), %s203_s7, 4294966784  ;;  %p1593_p13 = scmp.ne.s32.totalorder %s1581_s20, 0 }
  0x59   : > { %1241 = dma.done.wait (%p1593_p13), [#allocation6], 8192  }
  0x5a   : > { %1243 = vsyncadd (%p1593_p13), [#allocation6], 4294959104  ;;  %v1276_v0 = vmov 0.0|0.0   ;;  %vm1277_vm0 = vmmov 0   ;;  %v1278_v1 = vmov 0.0   ;;  %v259_v2 = vld [vmem:[#allocation5 + $0x80] sm:$0xff] }
  0x5b   : > { %952 = vmatprep.subr.bf16.mxu0 %v1276_v0  ;;  %976 = vmatprep.subr.bf16.mxu1 %v1276_v0  ;;  %v260_v3 = vld [vmem:[#allocation5 + $0x88] sm:$0xff]  ;;  %v240_v4 = vld [vmem:[#allocation5] sm:$0xff]  ;;  %v261_v7 = vld [vmem:[#allocation5 + $0x90] sm:$0xff]  ;;  %s734_s20 = sshll.u32 %s1458_s30, 3  ;;  %s740_s10 = sshll.u32 %s1262_s15, 7 }
  0x5c   : > { %844 = vmatprep.mubr.msk.f32.mxu0 %vm1277_vm0, %v1278_v1  ;;  %879 = vmatprep.mubr.msk.f32.mxu1 %vm1277_vm0, %v1278_v1  ;;  %v953_v5 = vpack.c.bf16 %v260_v3, %v259_v2  ;;  %v241_v6 = vld [vmem:[#allocation5 + $0x8] sm:$0xff]  ;;  %v262_v8 = vld [vmem:[#allocation5 + $0x98] sm:$0xff]  ;;  %v242_v10 = vld [vmem:[#allocation5 + $0x10] sm:$0xff]  ;;  %s235_s11 = scalar_lea.vmem [#allocation7], %s734_s20  ;;  %s1524_s25 = scalar_lea.hbm %s1576_s3, %s740_s10 }
  0x5d   : > { %v977_v9 = vpack.c.bf16 %v241_v6, %v240_v4  ;;  %v243_v11 = vld [vmem:[#allocation5 + $0x18] sm:$0xff]  ;;  %v956_v12 = vpack.c.bf16 %v262_v8, %v261_v7  ;;  %v263_v14 = vld [vmem:[#allocation5 + $0xa0] sm:$0xff]  ;;  %v264_v15 = vld [vmem:[#allocation5 + $0xa8] sm:$0xff]  ;;  %s619_s9 = sshll.u32 %s235_s11, 4  ;;  %s605_s26 = scalar_lea.sflag [#allocation4], %s1458_s30  ;;  %s1526_s9 = int_to_ptr.vmem [resolvable:$true] %s619_s9 }
  0x5e   : > { %954 = vmatpush3.bf16.msra.mxu0 %v953_v5  ;;  %v980_v13 = vpack.c.bf16 %v243_v11, %v242_v10  ;;  %v244_v16 = vld [vmem:[#allocation5 + $0x20] sm:$0xff]  ;;  %v245_v17 = vld [vmem:[#allocation5 + $0x28] sm:$0xff]  ;;  %v959_v18 = vpack.c.bf16 %v264_v15, %v263_v14  ;;  %v265_v20 = vld [vmem:[#allocation5 + $0xb0] sm:$0xff]  ;;  %s1184_s21 = scalar_lea.vmem %s1526_s9, 128  ;;  %s1279_s15 = smov [#allocation7]  }
  0x5f   : > { %978 = vmatpush3.bf16.msra.mxu1 %v977_v9  ;;  %955 = vmatprep.subr.bf16.mxu0 %v1276_v0  ;;  %v983_v19 = vpack.c.bf16 %v245_v17, %v244_v16  ;;  %v266_v21 = vld [vmem:[#allocation5 + $0xb8] sm:$0xff]  ;;  %v246_v22 = vld [vmem:[#allocation5 + $0x30] sm:$0xff]  ;;  %v267_v26 = vld [vmem:[#allocation5 + $0xc0] sm:$0xff]  ;;  %p1185_p4 = scmp.ne.s32.totalorder %s1526_s9, %s1184_s21  ;;  %s1188_s4 = sshll.u32 %s1279_s15, 4  ;;  %s1189_s4 = int_to_ptr.vmem [resolvable:$false] %s1188_s4 }
  0x60   : > { %979 = vmatprep.subr.bf16.mxu1 %v1276_v0  ;;  %v247_v23 = vld [vmem:[#allocation5 + $0x38] sm:$0xff]  ;;  %v962_v24 = vpack.c.bf16 %v266_v21, %v265_v20  ;;  %v268_v27 = vld [vmem:[#allocation5 + $0xc8] sm:$0xff]  ;;  %v248_v28 = vld [vmem:[#allocation5 + $0x40] sm:$0xff]  ;;  %s1190_s6 = scalar_lea.vmem %s1189_s4, 256  ;;  %p1191_p12 = scmp.lt.s32.totalorder %s1526_s9, %s1189_s4 }
  0x61   : > { %v986_v25 = vpack.c.bf16 %v247_v23, %v246_v22  ;;  %v249_v29 = vld [vmem:[#allocation5 + $0x48] sm:$0xff]  ;;  %v965_v30 = vpack.c.bf16 %v268_v27, %v267_v26  ;;  %v269_v32 = vld [vmem:[#allocation5 + $0xd0] sm:$0xff]  ;;  %v270_v33 = vld [vmem:[#allocation5 + $0xd8] sm:$0xff]  ;;  %p1186_p6 = pnand %p1185_p4, %p1399_p10  ;;  %p1192_p11 = scmp.lt.s32.totalorder %s1190_s6, %s1184_s21 }
  0x62   : > { %957 = vmatpush3.bf16.msra.mxu0 %v956_v12  ;;  %v989_v31 = vpack.c.bf16 %v249_v29, %v248_v28  ;;  %v250_v34 = vld [vmem:[#allocation5 + $0x50] sm:$0xff]  ;;  %v251_v35 = vld [vmem:[#allocation5 + $0x58] sm:$0xff]  ;;  %v968_v36 = vpack.c.bf16 %v270_v33, %v269_v32  ;;  %v271_v38 = vld [vmem:[#allocation5 + $0xe0] sm:$0xff] }
  0x63   : > { %981 = vmatpush3.bf16.msra.mxu1 %v980_v13  ;;  %958 = vmatprep.subr.bf16.mxu0 %v1276_v0  ;;  %v992_v37 = vpack.c.bf16 %v251_v35, %v250_v34  ;;  %v272_v39 = vld [vmem:[#allocation5 + $0xe8] sm:$0xff]  ;;  %v252_v40 = vld [vmem:[#allocation5 + $0x60] sm:$0xff]  ;;  %v273_v44 = vld [vmem:[#allocation5 + $0xf0] sm:$0xff]  ;;  %p1187_p8 = pneg %p1186_p6  ;;  %p1193_p0 = por %p1192_p11, %p1191_p12 }
  0x64   : > { %982 = vmatprep.subr.bf16.mxu1 %v1276_v0  ;;  %v253_v41 = vld [vmem:[#allocation5 + $0x68] sm:$0xff]  ;;  %v971_v42 = vpack.c.bf16 %v272_v39, %v271_v38  ;;  %v274_v45 = vld [vmem:[#allocation5 + $0xf8] sm:$0xff]  ;;  %v254_v46 = vld [vmem:[#allocation5 + $0x70] sm:$0xff] }
  0x65   : > { %v995_v43 = vpack.c.bf16 %v253_v41, %v252_v40  ;;  %v255_v47 = vld [vmem:[#allocation5 + $0x78] sm:$0xff]  ;;  %v974_v48 = vpack.c.bf16 %v274_v45, %v273_v44  ;;  %v418_v50 = vld [vmem:[#allocation5 + $0x100] sm:$0xff]  ;;  %v419_v51 = vld [vmem:[#allocation5 + $0x108] sm:$0xff]  ;;  %p1194_p5 = pnand %p1193_p0, %p1187_p8 }
  0x66   : > { %960 = vmatpush3.bf16.msra.mxu0 %v959_v18  ;;  %v998_v49 = vpack.c.bf16 %v255_v47, %v254_v46  ;;  %v508_v52 = vld [vmem:[#allocation5 + $0x180] sm:$0xff]  ;;  %v509_v53 = vld [vmem:[#allocation5 + $0x188] sm:$0xff]  ;;  %v1001_v55 = vpack.c.bf16 %v419_v51, %v418_v50  ;;  %v420_v58 = vld [vmem:[#allocation5 + $0x110] sm:$0xff] }
  0x67   : > { %984 = vmatpush3.bf16.msra.mxu1 %v983_v19  ;;  %961 = vmatprep.subr.bf16.mxu0 %v1276_v0  ;;  %v735_v54 = vld [vmem:[%s1462_s8 + $0x8] sm:$0xff]  ;;  %v239_v56 = vld [vmem:[%s1462_s8] sm:$0xff]  ;;  %v1025_v57 = vpack.c.bf16 %v509_v53, %v508_v52  ;;  %v421_v59 = vld [vmem:[#allocation5 + $0x118] sm:$0xff] }
  0x68   : > { %985 = vmatprep.subr.bf16.mxu1 %v1276_v0  ;;  %v510_v60 = vld [vmem:[#allocation5 + $0x190] sm:$0xff]  ;;  %v511_v61 = vld [vmem:[#allocation5 + $0x198] sm:$0xff]  ;;  %v1004_v62 = vpack.c.bf16 %v421_v59, %v420_v58  ;;  %v422_v2 = vld [vmem:[#allocation5 + $0x120] sm:$0xff] }
  0x69   : > { %v1028_v63 = vpack.c.bf16 %v511_v61, %v510_v60  ;;  %v423_v3 = vld [vmem:[#allocation5 + $0x128] sm:$0xff]  ;;  %v512_v4 = vld [vmem:[#allocation5 + $0x1a0] sm:$0xff]  ;;  %v424_v8 = vld [vmem:[#allocation5 + $0x130] sm:$0xff] }
  0x6a   : > { %963 = vmatpush3.bf16.msra.mxu0 %v962_v24  ;;  %v513_v5 = vld [vmem:[#allocation5 + $0x1a8] sm:$0xff]  ;;  %v1007_v6 = vpack.c.bf16 %v423_v3, %v422_v2  ;;  %v425_v9 = vld [vmem:[#allocation5 + $0x138] sm:$0xff]  ;;  %v514_v10 = vld [vmem:[#allocation5 + $0x1b0] sm:$0xff] }
  0x6b   : > { %987 = vmatpush3.bf16.msra.mxu1 %v986_v25  ;;  %964 = vmatprep.subr.bf16.mxu0 %v1276_v0  ;;  %v1031_v7 = vpack.c.bf16 %v513_v5, %v512_v4  ;;  %v515_v11 = vld [vmem:[#allocation5 + $0x1b8] sm:$0xff]  ;;  %v1010_v12 = vpack.c.bf16 %v425_v9, %v424_v8  ;;  %v426_v14 = vld [vmem:[#allocation5 + $0x140] sm:$0xff]  ;;  %v517_v16 = vld [vmem:[#allocation5 + $0x1c8] sm:$0xff] }
  0x6c   : > { %988 = vmatprep.subr.bf16.mxu1 %v1276_v0  ;;  %v1034_v13 = vpack.c.bf16 %v515_v11, %v514_v10  ;;  %v516_v15 = vld [vmem:[#allocation5 + $0x1c0] sm:$0xff]  ;;  %v428_v19 = vld [vmem:[#allocation5 + $0x150] sm:$0xff]  ;;  %v429_v20 = vld [vmem:[#allocation5 + $0x158] sm:$0xff] }
  0x6d   : > { %v1037_v18 = vpack.c.bf16 %v517_v16, %v516_v15  ;;  %v518_v21 = vld [vmem:[#allocation5 + $0x1d0] sm:$0xff]  ;;  %v519_v22 = vld [vmem:[#allocation5 + $0x1d8] sm:$0xff]  ;;  %v1016_v23 = vpack.c.bf16 %v429_v20, %v428_v19  ;;  %v430_v25 = vld [vmem:[#allocation5 + $0x160] sm:$0xff] }
  0x6e   : > { %966 = vmatpush3.bf16.msra.mxu0 %v965_v30  ;;  %v1040_v24 = vpack.c.bf16 %v519_v22, %v518_v21  ;;  %v431_v26 = vld [vmem:[#allocation5 + $0x168] sm:$0xff]  ;;  %v520_v27 = vld [vmem:[#allocation5 + $0x1e0] sm:$0xff]  ;;  %v433_v32 = vld [vmem:[#allocation5 + $0x178] sm:$0xff] }
  0x6f   : > { %990 = vmatpush3.bf16.msra.mxu1 %v989_v31  ;;  %967 = vmatprep.subr.bf16.mxu0 %v1276_v0  ;;  %v521_v28 = vld [vmem:[#allocation5 + $0x1e8] sm:$0xff]  ;;  %v1019_v29 = vpack.c.bf16 %v431_v26, %v430_v25  ;;  %v432_v31 = vld [vmem:[#allocation5 + $0x170] sm:$0xff]  ;;  %v523_v34 = vld [vmem:[#allocation5 + $0x1f8] sm:$0xff] }
  0x70   : > { %991 = vmatprep.subr.bf16.mxu1 %v1276_v0  ;;  %v1043_v30 = vpack.c.bf16 %v521_v28, %v520_v27  ;;  %v522_v33 = vld [vmem:[#allocation5 + $0x1f0] sm:$0xff]  ;;  %v1022_v35 = vpack.c.bf16 %v433_v32, %v432_v31  ;;  %v737_v38 = vld [vmem:[%s1462_s8 + $0x18] sm:$0xff] }
  0x72   : > { %969 = vmatpush3.bf16.msra.mxu0 %v968_v36  ;;  %v1046_v36 = vpack.c.bf16 %v523_v34, %v522_v33 }
  0x73   : > { %993 = vmatpush3.bf16.msra.mxu1 %v992_v37  ;;  %970 = vmatprep.subr.bf16.mxu0 %v1276_v0  ;;  %v736_v37 = vld [vmem:[%s1462_s8 + $0x10] sm:$0xff] }
  0x74   : > { %994 = vmatprep.subr.bf16.mxu1 %v1276_v0 }
  0x76   : > { %972 = vmatpush3.bf16.msra.mxu0 %v971_v42 }
  0x77   : > { %996 = vmatpush3.bf16.msra.mxu1 %v995_v43  ;;  %973 = vmatprep.subr.bf16.mxu0 %v1276_v0 }
  0x78   : > { %997 = vmatprep.subr.bf16.mxu1 %v1276_v0 }
  0x7a   : > { %975 = vmatpush3.bf16.msra.mxu0 %v974_v48 }
  0x7b   : > { %999 = vmatpush3.bf16.msra.mxu1 %v998_v49  ;;  %1000 = vmatprep.subr.bf16.mxu0 %v1276_v0 }
  0x7c   : > { %1024 = vmatprep.subr.bf16.mxu1 %v1276_v0 }
  0x7d   : > { %845 = vmatmul.mubr.f32.vlgmr.msra.gmra.mrb[0].mxu0 %v735_v54 }
  0x7e   : > { %880 = vmatmul.mubr.f32.vlgmr.msra.gmra.mrb[0].mxu1 %v239_v56  ;;  %1002 = vmatpush3.bf16.msra.mxu0 %v1001_v55 }
  0x7f   : > { %1026 = vmatpush3.bf16.msra.mxu1 %v1025_v57  ;;  %1003 = vmatprep.subr.bf16.mxu0 %v1276_v0 }
  0x80   : > { %1027 = vmatprep.subr.bf16.mxu1 %v1276_v0  ;;  %914 = vmatprep.mubr.msk.f32.mxu0 %vm1277_vm0, %v1278_v1 }
  0x81   : > { %949 = vmatprep.mubr.msk.f32.mxu1 %vm1277_vm0, %v1278_v1  ;;  %v427_v1 = vld [vmem:[#allocation5 + $0x148] sm:$0xff] }
  0x82   : > { %1005 = vmatpush3.bf16.msra.mxu0 %v1004_v62  ;;  %v1013_v17 = vpack.c.bf16 %v427_v1, %v426_v14 }
  0x83   : > { %1029 = vmatpush3.bf16.msra.mxu1 %v1028_v63  ;;  %1006 = vmatprep.subr.bf16.mxu0 %v1276_v0 }
  0x84   : > { %1030 = vmatprep.subr.bf16.mxu1 %v1276_v0 }
  0x86   : > { %1008 = vmatpush3.bf16.msra.mxu0 %v1007_v6 }
  0x87   : > { %1032 = vmatpush3.bf16.msra.mxu1 %v1031_v7  ;;  %1009 = vmatprep.subr.bf16.mxu0 %v1276_v0 }
  0x88   : > { %1033 = vmatprep.subr.bf16.mxu1 %v1276_v0 }
  0x8a   : > { %1011 = vmatpush3.bf16.msra.mxu0 %v1010_v12 }
  0x8b   : > { %1035 = vmatpush3.bf16.msra.mxu1 %v1034_v13  ;;  %1012 = vmatprep.subr.bf16.mxu0 %v1276_v0 }
  0x8c   : > { %1036 = vmatprep.subr.bf16.mxu1 %v1276_v0 }
  0x8e   : > { %1014 = vmatpush3.bf16.msra.mxu0 %v1013_v17 }
  0x8f   : > { %1038 = vmatpush3.bf16.msra.mxu1 %v1037_v18  ;;  %1015 = vmatprep.subr.bf16.mxu0 %v1276_v0 }
  0x90   : > { %1039 = vmatprep.subr.bf16.mxu1 %v1276_v0 }
  0x92   : > { %1017 = vmatpush3.bf16.msra.mxu0 %v1016_v23 }
  0x93   : > { %1041 = vmatpush3.bf16.msra.mxu1 %v1040_v24  ;;  %1018 = vmatprep.subr.bf16.mxu0 %v1276_v0 }
  0x94   : > { %1042 = vmatprep.subr.bf16.mxu1 %v1276_v0 }
  0x96   : > { %1020 = vmatpush3.bf16.msra.mxu0 %v1019_v29 }
  0x97   : > { %1044 = vmatpush3.bf16.msra.mxu1 %v1043_v30  ;;  %1021 = vmatprep.subr.bf16.mxu0 %v1276_v0 }
  0x98   : > { %1045 = vmatprep.subr.bf16.mxu1 %v1276_v0  ;;  %v738_v0 = vld [vmem:[%s1575_s2] ss:$0 sm:$0xff] }
  0x9a   : > { %1023 = vmatpush3.bf16.msra.mxu0 %v1022_v35 }
  0x9b   : > { %1047 = vmatpush3.bf16.msra.mxu1 %v1046_v36 }
  0x9d   : > { %915 = vmatmul.mubr.f32.vlgmr.msra.gmra.mrb[2].mxu0 %v736_v37 }
  0x9e   : > { %950 = vmatmul.mubr.f32.vlgmr.msra.gmra.mrb[2].mxu1 %v737_v38 }
 0x150   : > { %v341_v39 = vpop.f32.mrb[0].mxu0 }
 0x151   : > { %v846_v40 = vpop.f32.mrb[1].mxu0  ;;  %v411_v41 = vpop.f32.mrb[0].mxu1 }
 0x152   : > { %v412_v42 = vadd.f32 %v411_v41, %v341_v39  ;;  %v881_v43 = vpop.f32.mrb[1].mxu1 }
 0x170   : > { %v500_v44 = vpop.f32.mrb[2].mxu0 }
 0x171   : > { %v504_v45 = vadd.f32 %v500_v44, %v412_v42  ;;  %v916_v46 = vpop.f32.mrb[3].mxu0  ;;  %v590_v47 = vpop.f32.mrb[2].mxu1 }
 0x172   : > { %v951_v48 = vpop.f32.mrb[3].mxu1 }
 0x173   : > { %v594_v49 = vadd.f32 %v590_v47, %v504_v45 }
 0x175   : > { %v602_v50 = vadd.f32 %v738_v0, %v594_v49 }
 0x177   : > { %603 = vst [vmem:[%s235_s11] sm:$0xff] %v602_v50 }
 0x178   : > { %1197 = shalt.err (!%p1194_p5)
}
 0x179   : > { %s1198_s30 = scalar_lea.hbm %s1524_s25, 128  ;;  %s1202_s8 = scalar_lea.hbm %s1576_s3, 256 }
 0x17a   : > { %p1199_p9 = scmp.ne.s32.totalorder %s1524_s25, %s1198_s30  ;;  %p1203_p3 = scmp.lt.u32.totalorder %s1524_s25, %s1576_s3 }
 0x17b   : > { %p1204_p7 = scmp.lt.u32.totalorder %s1202_s8, %s1198_s30  ;;  %p1206_p4 = scmp.lt.u32.totalorder %s1198_s30, %s1524_s25 }
 0x17c   : > { %p1200_p1 = pnand %p1199_p9, %p1399_p10 }
 0x17d   : > { %p1205_p13 = por %p1204_p7, %p1203_p3 }
 0x17e   : > { %p1201_p2 = pneg %p1200_p1 }
 0x17f   : > { %p1207_p6 = por %p1206_p4, %p1205_p13 }
 0x181   : > { %p1208_p8 = pnand %p1207_p6, %p1201_p2 }
 0x183   : > { %1211 = shalt.err (!%p1208_p8)
}
 0x184   : > { %1054 = dma.vmem_to_hbm [thread:$0]  (%p1399_p10), %s1526_s9, 128, %s1524_s25, %s605_s26  }
 0x185 PF: > { %s631_s24 = sand.u32 1, %s1250_s12   ;;  %p1594_p12 = scmp.ne.s32.totalorder %s1584_s23, 0 }
 0x186   : > { %p1595_p11 = scmp.ge.s32.totalorder %s1270_s17, 2  ;;  %s632_s10 = scalar_lea.sflag [#allocation4], %s631_s24 }
 0x188   : > { %p1065_p0 = pnand %p1595_p11, %p1594_p12 }
 0x18a   : > { %1245 = dma.done.wait (!%p1065_p0), %s632_s10, 128  }
 0x18b   : > { %1247 = vsyncadd (!%p1065_p0), %s632_s10, 4294967168  ;;  %s20_s17 = sadd.s32 1, %s1270_s17   ;;  %s1596_s12 = smov %s1254_s13 }
 0x18c   : > { %p17_p5 = scmp.ge.s32.totalorder %s20_s17, 4   ;;  %s1597_s13 = smov %s1258_s14 }
 0x18d   : > { %s1598_s14 = smov %s1408_s5  ;;  %s1599_s15 = smov %s1266_s16 }
 0x18e   : > { %s1600_s16 = smov %s1602_s28  ;;  %19 = sbr.rel (!%p17_p5) target bundleno = 7 (0x7), region = 91 }
 0x195   :  { %637 = vsyncpa [#allocation3], 1 }
 0x196   :  { %639 = vsyncpa [#allocation3 + $0x1], 1 }
 0x197   :  { %640 = vsyncpa [#allocation6], 1 }
 0x198   :  { %641 = vsyncpa [#allocation4], 1 }
 0x199   :  { %643 = vsyncpa [#allocation4 + $0x1], 1 }

</bundles_post_ra>
